<compile_context>
chip_gen: v6e
topology: v6e:2x2x1
jax: 0.10.0
libtpu: 0.0.40
codegen_flags: <defaults>
</compile_context>

<pallas_src>
import functools

import jax
import jax.numpy as jnp
from jax.experimental import pallas as pl
from jax.experimental.pallas import tpu as pltpu


def _round_up(n, m):
    return (n + m - 1) // m * m


def _choose_bm(B, block_batch):
    """Rows per grid step: multiple of 16 (bf16 sublane tiling), capped at
    block_batch, >= 2 (and even) steps when B allows it so v7x's two
    TensorCores both get work, and sized so the padded fraction stays small."""
    bm_cap = max(16, min(block_batch, _round_up(B, 16)))
    n_steps = -(-B // bm_cap)                     # ceil
    if B > 16:
        n_steps = max(n_steps, 2)                 # >= 2 steps for megacore
        if n_steps % 2:
            n_steps += 1                          # balanced split across 2 TCs
    return min(bm_cap, _round_up(-(-B // n_steps), 16))


def dueling_head_kernel(x_ref, w1_ref, b1_ref, w2_ref, b2_ref, w3_ref, b3_ref,
                        head_ref, psum_ref, *, bm, batch):
    """Fused 3-layer MLP.

    head_ref: (bm, 128) bf16 slab, row i = [val_i | adv_i(0..A-1) | zero-pad].
    psum_ref: (8, 128) f32; row 0 = column sums of this tile's head (rows >= batch
              masked out), rows 1..7 = 0.  Used for the global adv mean.
    """
    x = x_ref[...]                                                      # (bm, S) bf16
    h1 = jnp.dot(x, w1_ref[...], preferred_element_type=jnp.float32)
    h1 = jnp.maximum(h1 + b1_ref[...], 0.0)                             # f32 ReLU
    h2 = jnp.dot(h1.astype(jnp.bfloat16), w2_ref[...],
                 preferred_element_type=jnp.float32)
    h2 = jnp.maximum(h2 + b2_ref[...], 0.0)
    h3 = jnp.dot(h2.astype(jnp.bfloat16), w3_ref[...],
                 preferred_element_type=jnp.float32)
    h3 = h3 + b3_ref[...]                                               # (bm, 128) f32
    hw = h3.shape[1]

    # bf16 head slab (halves HBM writeback and the wrapper's re-read).
    head_ref[...] = h3.astype(jnp.bfloat16)

    # Masked per-tile column sums in f32 (padded rows would otherwise leak
    # bias-propagated garbage into the global mean).
    row0 = pl.program_id(0) * bm
    rows = jax.lax.broadcasted_iota(jnp.int32, (bm, hw), 0) + row0
    h3m = jnp.where(rows < batch, h3, 0.0)
    col_sum = jnp.sum(h3m, axis=0, keepdims=True)                       # (1, hw)
    sub = jax.lax.broadcasted_iota(jnp.int32, (8, hw), 0)
    psum_ref[...] = jnp.where(sub == 0, col_sum, 0.0)                   # (8, hw)


@functools.partial(jax.jit, static_argnames=("action_size", "block_batch"))
def dueling_dqn_forward(x, fused, *, action_size, block_batch=2048):
    """x: (B, state_size) f32. fused: output of fuse_params. Returns (B, A) f32."""
    B, S = x.shape
    head_w = fused["w3"].shape[1]                 # 128-wide lane-dense head
    assert head_w >= 1 + action_size

    bm = _choose_bm(B, block_batch)
    B_pad = _round_up(B, bm)
    n_tiles = B_pad // bm

    x_bf = x.astype(jnp.bfloat16)                 # halve input DMA / VMEM buffer
    if B_pad != B:
        x_bf = jnp.pad(x_bf, ((0, B_pad - B), (0, 0)))

    kernel = functools.partial(dueling_head_kernel, bm=bm, batch=B)

    def resident(a):                              # weights stay in VMEM across steps
        return pl.BlockSpec(a.shape, lambda i: (0, 0))

    head, psums = pl.pallas_call(
        kernel,
        out_shape=(
            jax.ShapeDtypeStruct((B_pad, head_w), jnp.bfloat16),
            jax.ShapeDtypeStruct((n_tiles * 8, head_w), jnp.float32),
        ),
        grid_spec=pltpu.PrefetchScalarGridSpec(
            num_scalar_prefetch=0,
            grid=(n_tiles,),
            in_specs=[
                pl.BlockSpec((bm, S), lambda i: (i, 0)),     # x tile
                resident(fused["w1"]), resident(fused["b1"]),
                resident(fused["w2"]), resident(fused["b2"]),
                resident(fused["w3"]), resident(fused["b3"]),
            ],
            out_specs=[
                pl.BlockSpec((bm, head_w), lambda i: (i, 0)),   # head slab
                pl.BlockSpec((8, head_w), lambda i: (i, 0)),    # per-tile col sums
            ],
        ),
        compiler_params=pltpu.CompilerParams(
            dimension_semantics=("parallel",),    # v7x megacore; harmless on v5e/v6e
            vmem_limit_bytes=48 * 1024 * 1024,    # <= v7x's ~48 MiB safe cap
        ),
    )(x_bf, fused["w1"], fused["b1"], fused["w2"], fused["b2"],
      fused["w3"], fused["b3"])

    # Global adv mean (torch `adv.mean()` = mean over batch AND actions),
    # accumulated in f32 from the tiny (n_tiles*8, 128) partial-sum array.
    col_sums = jnp.sum(psums, axis=0)                              # (head_w,)
    adv_mean = jnp.sum(col_sums[1:1 + action_size]) / (B * action_size)

    head = head[:B].astype(jnp.float32)
    val = head[:, 0:1]                                             # (B, 1)
    adv = head[:, 1:1 + action_size]                               # (B, A)
    return val + adv - adv_mean


def init_params(key, state_size, action_size, fc1_units=64, fc2_units=64):
    """nn.Linear-style init. Weights stored (in, out); biases (1, out)."""
    def linear(key, fan_in, fan_out):
        kw, kb = jax.random.split(key)
        bound = 1.0 / jnp.sqrt(jnp.float32(fan_in))
        w = jax.random.uniform(kw, (fan_in, fan_out), jnp.float32, -bound, bound)
        b = jax.random.uniform(kb, (1, fan_out), jnp.float32, -bound, bound)
        return w, b

    keys = jax.random.split(key, 6)
    w1v, b1v = linear(keys[0], state_size, fc1_units)
    w2v, b2v = linear(keys[1], fc1_units, fc2_units)
    w3v, b3v = linear(keys[2], fc2_units, 1)
    w1a, b1a = linear(keys[3], state_size, fc1_units)
    w2a, b2a = linear(keys[4], fc1_units, fc2_units)
    w3a, b3a = linear(keys[5], fc2_units, action_size)
    return dict(
        w1v=w1v, b1v=b1v, w2v=w2v, b2v=b2v, w3v=w3v, b3v=b3v,
        w1a=w1a, b1a=b1a, w2a=w2a, b2a=b2a, w3a=w3a, b3a=b3a,
    )


def fuse_params(p, action_size):
    """One-time fusion of the two streams into lane-dense bf16 weights."""
    H1 = p["w1v"].shape[1]
    H2 = p["w2v"].shape[1]
    A = action_size
    head_width = _round_up(1 + A, 128)

    w1 = jnp.concatenate([p["w1v"], p["w1a"]], axis=1)           # (S, 2*H1)
    b1 = jnp.concatenate([p["b1v"], p["b1a"]], axis=1)           # (1, 2*H1)

    z = jnp.zeros((H1, H2), jnp.float32)
    w2 = jnp.block([[p["w2v"], z], [z, p["w2a"]]])               # (2*H1, 2*H2)
    b2 = jnp.concatenate([p["b2v"], p["b2a"]], axis=1)           # (1, 2*H2)

    w3 = jnp.zeros((2 * H2, head_width), jnp.float32)
    w3 = w3.at[:H2, 0:1].set(p["w3v"])                           # val -> col 0
    w3 = w3.at[H2:, 1:1 + A].set(p["w3a"])                       # adv -> cols 1..A
    b3 = jnp.zeros((1, head_width), jnp.float32)
    b3 = b3.at[:, 0:1].set(p["b3v"])
    b3 = b3.at[:, 1:1 + A].set(p["b3a"])

    return dict(
        w1=w1.astype(jnp.bfloat16), b1=b1,
        w2=w2.astype(jnp.bfloat16), b2=b2,
        w3=w3.astype(jnp.bfloat16), b3=b3,
    )


def reference_forward_f32(x, p):
    """Pure-JAX f32 reference (original module semantics)."""
    val = jax.nn.relu(x @ p["w1v"] + p["b1v"])
    val = jax.nn.relu(val @ p["w2v"] + p["b2v"])
    val = val @ p["w3v"] + p["b3v"]
    adv = jax.nn.relu(x @ p["w1a"] + p["b1a"])
    adv = jax.nn.relu(adv @ p["w2a"] + p["b2a"])
    adv = adv @ p["w3a"] + p["b3a"]
    return val + adv - adv.mean()


def reference_forward_bf16(x, p):
    """Pure-JAX reference mirroring the kernel's bf16-in / f32-accumulate path."""
    def lin(h, w, b):
        return jnp.dot(h.astype(jnp.bfloat16), w.astype(jnp.bfloat16),
                       preferred_element_type=jnp.float32) + b
    val = jax.nn.relu(lin(x, p["w1v"], p["b1v"]))
    val = jax.nn.relu(lin(val, p["w2v"], p["b2v"]))
    val = lin(val, p["w3v"], p["b3v"])
    adv = jax.nn.relu(lin(x, p["w1a"], p["b1a"]))
    adv = jax.nn.relu(lin(adv, p["w2a"], p["b2a"]))
    adv = lin(adv, p["w3a"], p["b3a"])
    return val + adv - adv.mean()


if __name__ == "__main__":
    state_size = 8
    action_size = 4
    batch = 2

    key = jax.random.PRNGKey(0)
    kx, kp = jax.random.split(key)
    x = jax.random.normal(kx, (batch, state_size), jnp.float32)
    params = init_params(kp, state_size, action_size, fc1_units=64, fc2_units=64)
    fused = fuse_params(params, action_size)

    out = dueling_dqn_forward(x, fused, action_size=action_size)
    out = jax.block_until_ready(out)
    assert out.shape == (batch, action_size)

    # Also exercise a multi-tile grid (masking of padded rows + partial sums).
    x_big = jax.random.normal(jax.random.PRNGKey(1), (70, state_size), jnp.float32)
    out_big = jax.block_until_ready(
        dueling_dqn_forward(x_big, fused, action_size=action_size))
    ref_big = reference_forward_bf16(x_big, params)
    assert jnp.allclose(out_big, ref_big, atol=1e-2, rtol=1e-2), (out_big, ref_big)

    ref_bf16 = reference_forward_bf16(x, params)   # mirrors kernel precision path
    ref_f32 = reference_forward_f32(x, params)     # original f32 semantics
    # Slab is bf16, so per-element val/adv carry ~2^-9 relative rounding; the
    # adv mean itself is accumulated in f32 from the kernel's partial sums.
    assert jnp.allclose(out, ref_bf16, atol=1e-2, rtol=1e-2), (out, ref_bf16)
    assert jnp.allclose(out, ref_f32, atol=5e-2, rtol=5e-2), (out, ref_f32)

    print("KERNEL_OK")
</pallas_src>

<mosaic_0001>
module attributes {stable_mosaic.version = 11 : i64} {
  func.func @dueling_head_kernel(%arg0: i32, %arg1: memref<16x8xbf16, #tpu.memory_space<vmem>>, %arg2: memref<8x128xbf16, #tpu.memory_space<vmem>>, %arg3: memref<1x128xf32, #tpu.memory_space<vmem>>, %arg4: memref<128x128xbf16, #tpu.memory_space<vmem>>, %arg5: memref<1x128xf32, #tpu.memory_space<vmem>>, %arg6: memref<128x128xbf16, #tpu.memory_space<vmem>>, %arg7: memref<1x128xf32, #tpu.memory_space<vmem>>, %arg8: memref<16x128xbf16, #tpu.memory_space<vmem>>, %arg9: memref<8x128xf32, #tpu.memory_space<vmem>>) attributes {dimension_semantics = [#tpu.dimension_semantics<parallel>], iteration_bounds = array<i64: 1>, scalar_prefetch = 0 : i64, scratch_operands = 0 : i64, tpu.core_type = #tpu.core_type<tc>, window_params = [{transform_indices = @transform_0, window_bounds = array<i64: 16, 8>}, {pipeline_mode = #tpu.pipeline_mode<synchronous>, transform_indices = @transform_1, window_bounds = array<i64: 8, 128>}, {pipeline_mode = #tpu.pipeline_mode<synchronous>, transform_indices = @transform_2, window_bounds = array<i64: 1, 128>}, {pipeline_mode = #tpu.pipeline_mode<synchronous>, transform_indices = @transform_3, window_bounds = array<i64: 128, 128>}, {pipeline_mode = #tpu.pipeline_mode<synchronous>, transform_indices = @transform_4, window_bounds = array<i64: 1, 128>}, {pipeline_mode = #tpu.pipeline_mode<synchronous>, transform_indices = @transform_5, window_bounds = array<i64: 128, 128>}, {pipeline_mode = #tpu.pipeline_mode<synchronous>, transform_indices = @transform_6, window_bounds = array<i64: 1, 128>}, {transform_indices = @transform_7, window_bounds = array<i64: 16, 128>}, {transform_indices = @transform_8, window_bounds = array<i64: 8, 128>}]} {
    %c0 = arith.constant 0 : index
    %c0_0 = arith.constant 0 : index
    %0 = vector.load %arg1[%c0, %c0_0] : memref<16x8xbf16, #tpu.memory_space<vmem>>, vector<16x8xbf16>
    %c0_1 = arith.constant 0 : index
    %c0_2 = arith.constant 0 : index
    %1 = vector.load %arg2[%c0_1, %c0_2] : memref<8x128xbf16, #tpu.memory_space<vmem>>, vector<8x128xbf16>
    %cst = arith.constant dense<0.000000e+00> : vector<16x128xf32>
    %2 = tpu.matmul %0, %1, %cst {dimension_numbers = #tpu.dot_dimension_numbers<[1], [0], [0], [1], [0, 0, 1, 1], [], []>} : vector<16x8xbf16>, vector<8x128xbf16>, vector<16x128xf32> -> vector<16x128xf32>
    %c0_3 = arith.constant 0 : index
    %c0_4 = arith.constant 0 : index
    %3 = vector.load %arg3[%c0_3, %c0_4] : memref<1x128xf32, #tpu.memory_space<vmem>>, vector<1x128xf32>
    %4 = vector.broadcast %3 : vector<1x128xf32> to vector<16x128xf32>
    %5 = arith.addf %2, %4 : vector<16x128xf32>
    %cst_5 = arith.constant 0.000000e+00 : f32
    %6 = vector.broadcast %cst_5 : f32 to vector<16x128xf32>
    %7 = arith.maximumf %5, %6 : vector<16x128xf32>
    %8 = arith.truncf %7 : vector<16x128xf32> to vector<16x128xbf16>
    %c0_6 = arith.constant 0 : index
    %c0_7 = arith.constant 0 : index
    %9 = vector.load %arg4[%c0_6, %c0_7] : memref<128x128xbf16, #tpu.memory_space<vmem>>, vector<128x128xbf16>
    %cst_8 = arith.constant dense<0.000000e+00> : vector<16x128xf32>
    %10 = tpu.matmul %8, %9, %cst_8 {dimension_numbers = #tpu.dot_dimension_numbers<[1], [0], [0], [1], [0, 0, 1, 1], [], []>} : vector<16x128xbf16>, vector<128x128xbf16>, vector<16x128xf32> -> vector<16x128xf32>
    %c0_9 = arith.constant 0 : index
    %c0_10 = arith.constant 0 : index
    %11 = vector.load %arg5[%c0_9, %c0_10] : memref<1x128xf32, #tpu.memory_space<vmem>>, vector<1x128xf32>
    %12 = vector.broadcast %11 : vector<1x128xf32> to vector<16x128xf32>
    %13 = arith.addf %10, %12 : vector<16x128xf32>
    %cst_11 = arith.constant 0.000000e+00 : f32
    %14 = vector.broadcast %cst_11 : f32 to vector<16x128xf32>
    %15 = arith.maximumf %13, %14 : vector<16x128xf32>
    %16 = arith.truncf %15 : vector<16x128xf32> to vector<16x128xbf16>
    %c0_12 = arith.constant 0 : index
    %c0_13 = arith.constant 0 : index
    %17 = vector.load %arg6[%c0_12, %c0_13] : memref<128x128xbf16, #tpu.memory_space<vmem>>, vector<128x128xbf16>
    %cst_14 = arith.constant dense<0.000000e+00> : vector<16x128xf32>
    %18 = tpu.matmul %16, %17, %cst_14 {dimension_numbers = #tpu.dot_dimension_numbers<[1], [0], [0], [1], [0, 0, 1, 1], [], []>} : vector<16x128xbf16>, vector<128x128xbf16>, vector<16x128xf32> -> vector<16x128xf32>
    %c0_15 = arith.constant 0 : index
    %c0_16 = arith.constant 0 : index
    %19 = vector.load %arg7[%c0_15, %c0_16] : memref<1x128xf32, #tpu.memory_space<vmem>>, vector<1x128xf32>
    %20 = vector.broadcast %19 : vector<1x128xf32> to vector<16x128xf32>
    %21 = arith.addf %18, %20 : vector<16x128xf32>
    %22 = arith.truncf %21 : vector<16x128xf32> to vector<16x128xbf16>
    %c0_17 = arith.constant 0 : index
    %c0_18 = arith.constant 0 : index
    %23 = vector.load %arg8[%c0_17, %c0_18] : memref<16x128xbf16, #tpu.memory_space<vmem>>, vector<16x128xbf16>
    tpu.vector_store %arg8[%c0_17, %c0_18], %22 {strides = array<i32>} : memref<16x128xbf16, #tpu.memory_space<vmem>>, vector<16x128xbf16>,
    %c16_i32 = arith.constant 16 : i32
    %24 = arith.muli %arg0, %c16_i32 : i32
    %25 = tpu.iota {dimensions = array<i32: 0>} : vector<16x128xi32>
    %26 = vector.broadcast %24 : i32 to vector<16x128xi32>
    %27 = arith.addi %25, %26 : vector<16x128xi32>
    %c2_i32 = arith.constant 2 : i32
    %28 = vector.broadcast %c2_i32 : i32 to vector<16x128xi32>
    %29 = arith.cmpi slt, %27, %28 : vector<16x128xi32>
    %cst_19 = arith.constant 0.000000e+00 : f32
    %30 = vector.broadcast %cst_19 : f32 to vector<16x128xf32>
    %31 = arith.select %29, %21, %30 : vector<16x128xi1>, vector<16x128xf32>
    %cst_20 = arith.constant dense<0.000000e+00> : vector<128xf32>
    %32 = vector.multi_reduction <add>, %31, %cst_20 [0] : vector<16x128xf32> to vector<128xf32>
    %33 = vector.shape_cast %32 : vector<128xf32> to vector<1x128xf32>
    %34 = tpu.iota {dimensions = array<i32: 0>} : vector<8x128xi32>
    %c0_i32 = arith.constant 0 : i32
    %35 = vector.broadcast %c0_i32 : i32 to vector<8x128xi32>
    %36 = arith.cmpi eq, %34, %35 : vector<8x128xi32>
    %cst_21 = arith.constant 0.000000e+00 : f32
    %37 = vector.shape_cast %33 : vector<1x128xf32> to vector<1x128xf32>
    %38 = vector.broadcast %37 : vector<1x128xf32> to vector<8x128xf32>
    %39 = vector.broadcast %cst_21 : f32 to vector<8x128xf32>
    %40 = arith.select %36, %38, %39 : vector<8x128xi1>, vector<8x128xf32>
    %c0_22 = arith.constant 0 : index
    %c0_23 = arith.constant 0 : index
    %41 = vector.load %arg9[%c0_22, %c0_23] : memref<8x128xf32, #tpu.memory_space<vmem>>, vector<8x128xf32>
    tpu.vector_store %arg9[%c0_22, %c0_23], %40 {strides = array<i32>} : memref<8x128xf32, #tpu.memory_space<vmem>>, vector<8x128xf32>,
    return
  }
  func.func @transform_0(%arg0: i32) -> (i32, i32) {
    %c0_i32 = arith.constant 0 : i32
    %c0_i32_0 = arith.constant 0 : i32
    return %arg0, %c0_i32 : i32, i32
  }
  func.func @transform_1(%arg0: i32) -> (i32, i32) {
    %c0_i32 = arith.constant 0 : i32
    %c0_i32_0 = arith.constant 0 : i32
    %c0_i32_1 = arith.constant 0 : i32
    return %c0_i32, %c0_i32_0 : i32, i32
  }
  func.func @transform_2(%arg0: i32) -> (i32, i32) {
    %c0_i32 = arith.constant 0 : i32
    %c0_i32_0 = arith.constant 0 : i32
    %c0_i32_1 = arith.constant 0 : i32
    return %c0_i32, %c0_i32_0 : i32, i32
  }
  func.func @transform_3(%arg0: i32) -> (i32, i32) {
    %c0_i32 = arith.constant 0 : i32
    %c0_i32_0 = arith.constant 0 : i32
    %c0_i32_1 = arith.constant 0 : i32
    return %c0_i32, %c0_i32_0 : i32, i32
  }
  func.func @transform_4(%arg0: i32) -> (i32, i32) {
    %c0_i32 = arith.constant 0 : i32
    %c0_i32_0 = arith.constant 0 : i32
    %c0_i32_1 = arith.constant 0 : i32
    return %c0_i32, %c0_i32_0 : i32, i32
  }
  func.func @transform_5(%arg0: i32) -> (i32, i32) {
    %c0_i32 = arith.constant 0 : i32
    %c0_i32_0 = arith.constant 0 : i32
    %c0_i32_1 = arith.constant 0 : i32
    return %c0_i32, %c0_i32_0 : i32, i32
  }
  func.func @transform_6(%arg0: i32) -> (i32, i32) {
    %c0_i32 = arith.constant 0 : i32
    %c0_i32_0 = arith.constant 0 : i32
    %c0_i32_1 = arith.constant 0 : i32
    return %c0_i32, %c0_i32_0 : i32, i32
  }
  func.func @transform_7(%arg0: i32) -> (i32, i32) {
    %c0_i32 = arith.constant 0 : i32
    %c0_i32_0 = arith.constant 0 : i32
    return %arg0, %c0_i32 : i32, i32
  }
  func.func @transform_8(%arg0: i32) -> (i32, i32) {
    %c0_i32 = arith.constant 0 : i32
    %c0_i32_0 = arith.constant 0 : i32
    return %arg0, %c0_i32 : i32, i32
  }
}

</mosaic_0001>

<bundles_post_ra>
// kernel: dueling_dqn_forward.1
= control target key start
LH: loop header
LB: loop body
LE: loop exit
PB: predicated region body
PF: predicated region fallthrough
CT: control target
= control target key end

     0   :  { %14 = vsyncpa [#allocation3], 0  ;;  %s656_s0 = inlined_call_operand.vmem [shape: bf16[16,8], index: 0, kind: input, shape index: {}]   ;;  %s657_s1 = inlined_call_operand.vmem [shape: bf16[8,128], index: 1, kind: input, shape index: {}]   ;;  %s658_s2 = inlined_call_operand.vmem [shape: f32[1,128], index: 2, kind: input, shape index: {}]   ;;  %s659_s3 = inlined_call_operand.hbm [shape: bf16[128,128], index: 3, kind: input, shape index: {}]   ;;  %s660_s4 = inlined_call_operand.vmem [shape: f32[1,128], index: 4, kind: input, shape index: {}]   ;;  %s661_s5 = inlined_call_operand.hbm [shape: bf16[128,128], index: 5, kind: input, shape index: {}]   ;;  %s662_s6 = inlined_call_operand.vmem [shape: f32[1,128], index: 6, kind: input, shape index: {}]   ;;  %s663_s7 = inlined_call_operand.vmem [shape: bf16[16,128], index: 7, kind: output, shape index: {0}]   ;;  %s664_s8 = inlined_call_operand.vmem [shape: f32[8,128], index: 8, kind: output, shape index: {1}]  }
   0x1   :  { %15 = vsyncpa [#allocation5], 0  ;;  %s555_s27 = smov [#allocation2]  }
   0x2   :  { %s27_s28 = sshll.u32 %s555_s27, 4  ;;  %s28_s28 = int_to_ptr.vmem [resolvable:$true] %s27_s28 }
   0x3   :  { %s519_s29 = scalar_lea.vmem %s28_s28, 1024  ;;  %p524_p1 = scmp.lt.s32.totalorder %s28_s28, %s28_s28 }
   0x4   :  { %p520_p0 = scmp.ne.s32.totalorder %s28_s28, %s519_s29  ;;  %p525_p2 = scmp.lt.s32.totalorder %s519_s29, %s519_s29 }
   0x6   :  { %p526_p3 = por %p525_p2, %p524_p1 }
   0x8   :  { %p527_p4 = pnand %p526_p3, %p520_p0 }
   0xa   :  { %530 = shalt.err (!%p527_p4)
}
   0xb   :  { %s556_s30 = smov 64   ;;  %s557_s9 = smov 4  }
   0xc   :  { %33 = dma.hbm_to_vmem [thread:$0]  %s659_s3, 1024, %s28_s28, [#allocation3], %s556_s30, %s556_s30, %s557_s9  }
   0xd   :  { %s558_s12 = smov [#allocation4]  }
   0xe   :  { %s41_s13 = sshll.u32 %s558_s12, 4  ;;  %s42_s13 = int_to_ptr.vmem [resolvable:$true] %s41_s13 }
   0xf   :  { %s539_s14 = scalar_lea.vmem %s42_s13, 1024  ;;  %p544_p6 = scmp.lt.s32.totalorder %s42_s13, %s42_s13 }
  0x10   :  { %p540_p5 = scmp.ne.s32.totalorder %s42_s13, %s539_s14  ;;  %p545_p7 = scmp.lt.s32.totalorder %s539_s14, %s539_s14 }
  0x12   :  { %p546_p8 = por %p545_p7, %p544_p6 }
  0x14   :  { %p547_p9 = pnand %p546_p8, %p540_p5 }
  0x16   :  { %550 = shalt.err (!%p547_p9)
}
  0x17   :  { %47 = dma.hbm_to_vmem [thread:$0]  %s661_s5, 1024, %s42_s13, [#allocation5], %s556_s30, %s556_s30, %s557_s9  }
  0x18   :  { %551 = dma.done.wait [#allocation3], 1024  }
  0x19   :  { %552 = vsyncadd [#allocation3], 4294966272 }
  0x1a   :  { %553 = dma.done.wait [#allocation5], 1024  }
  0x1b   :  { %554 = vsyncadd [#allocation5], 4294966272  ;;  %v559_v0 = vmov 0.0   ;;  %vm560_vm0 = vmmov 0   ;;  %vm76_vm1 = vcmask 1043456   ;;  %v494_v3 = vld [vmem:[%s656_s0] sm:$0xff]   ;;  %v362_v40 = vlaneseq }
  0x1c   :  { %442 = vmatprep.subr.bf16.mxu0 %v559_v0  ;;  %444 = vmatprep.mubr.msk.bf16.mxu0 %vm560_vm0, %v559_v0  ;;  %v59_v1 = vld [vmem:[%s657_s1] sm:$0xf]  ;;  %vm72_vm2 = vcmask 64512   ;;  %v495_v4 = vld [vmem:[#allocation2 + $0x38] sm:$0xff]   ;;  %v496_v5 = vld [vmem:[#allocation2 + $0x30] sm:$0xff]  }
  0x1d   :  { %448 = vmatprep.subr.bf16.mxu1 %v559_v0  ;;  %464 = vmatprep.mubr.msk.bf16.mxu1 %vm560_vm0, %v559_v0  ;;  %v78_v2 = vsel %vm76_vm1, %v59_v1, 0  ;;  %v497_v6 = vld [vmem:[#allocation2 + $0x28] sm:$0xff]   ;;  %v498_v7 = vld [vmem:[#allocation2 + $0x20] sm:$0xff]   ;;  %v499_v8 = vld [vmem:[#allocation2 + $0x18] sm:$0xff]   ;;  %v363_v41 = vshrl.u32 %v362_v40, 7 }
  0x1e   :  { %443 = vmatpush3.bf16.msra.mxu0 %v78_v2  ;;  %449 = vmatpush3.bf16.msra.mxu1 %v495_v4  ;;  %v500_v9 = vld [vmem:[#allocation2 + $0x10] sm:$0xff]   ;;  %v501_v10 = vld [vmem:[#allocation2 + $0x8] sm:$0xff]   ;;  %v502_v11 = vld [vmem:[#allocation2] sm:$0xff]  }
  0x1f   :  { %468 = vmatprep.subr.bf16.mxu0 %v559_v0  ;;  %450 = vmatprep.subr.bf16.mxu1 %v559_v0  ;;  %v503_v12 = vld [vmem:[#allocation4 + $0x38] sm:$0xff]   ;;  %v504_v13 = vld [vmem:[#allocation4 + $0x30] sm:$0xff]   ;;  %v505_v14 = vld [vmem:[#allocation4 + $0x28] sm:$0xff]   ;;  %vm368_vm3 = vcmp.lt.s32.totalorder %v363_v41, 2  ;;  %vm379_vm4 = vcmp.eq.s32.totalorder %v363_v41, 0 }
  0x20   :  { %v506_v15 = vld [vmem:[#allocation4 + $0x20] sm:$0xff]   ;;  %v507_v16 = vld [vmem:[#allocation4 + $0x18] sm:$0xff]   ;;  %v508_v27 = vld [vmem:[#allocation4 + $0x10] sm:$0xff]  }
  0x21   :  { %445 = vmatmul.mubr.msk.bf16.vlgmr.msra.gmra.mxu0 %vm72_vm2, %v494_v3  ;;  %v392_v17 = vld [vmem:[%s658_s2] ss:$0 sm:$0xff]  ;;  %v509_v28 = vld [vmem:[#allocation4 + $0x8] sm:$0xff]  }
  0x22   :  { %484 = vmatprep.mubr.msk.bf16.mxu0 %vm560_vm0, %v559_v0  ;;  %451 = vmatpush3.bf16.msra.mxu1 %v496_v5  ;;  %v510_v29 = vld [vmem:[#allocation4] sm:$0xff]  }
  0x23   :  { %452 = vmatprep.subr.bf16.mxu1 %v559_v0  ;;  %469 = vmatpush3.bf16.msra.mxu0 %v503_v12  ;;  %v395_v30 = vld [vmem:[%s660_s4] ss:$0 sm:$0xff] }
  0x24   :  { %470 = vmatprep.subr.bf16.mxu0 %v559_v0  ;;  %v404_v42 = vld [vmem:[%s662_s6] ss:$0 sm:$0xff] }
  0x26   :  { %453 = vmatpush3.bf16.msra.mxu1 %v497_v6 }
  0x27   :  { %454 = vmatprep.subr.bf16.mxu1 %v559_v0  ;;  %471 = vmatpush3.bf16.msra.mxu0 %v504_v13 }
  0x28   :  { %472 = vmatprep.subr.bf16.mxu0 %v559_v0 }
  0x2a   :  { %455 = vmatpush3.bf16.msra.mxu1 %v498_v7 }
  0x2b   :  { %456 = vmatprep.subr.bf16.mxu1 %v559_v0  ;;  %473 = vmatpush3.bf16.msra.mxu0 %v505_v14 }
  0x2c   :  { %474 = vmatprep.subr.bf16.mxu0 %v559_v0 }
  0x2e   :  { %457 = vmatpush3.bf16.msra.mxu1 %v499_v8 }
  0x2f   :  { %458 = vmatprep.subr.bf16.mxu1 %v559_v0  ;;  %475 = vmatpush3.bf16.msra.mxu0 %v506_v15 }
  0x30   :  { %476 = vmatprep.subr.bf16.mxu0 %v559_v0 }
  0x32   :  { %459 = vmatpush3.bf16.msra.mxu1 %v500_v9 }
  0x33   :  { %460 = vmatprep.subr.bf16.mxu1 %v559_v0  ;;  %477 = vmatpush3.bf16.msra.mxu0 %v507_v16 }
  0x34   :  { %478 = vmatprep.subr.bf16.mxu0 %v559_v0 }
  0x36   :  { %461 = vmatpush3.bf16.msra.mxu1 %v501_v10 }
  0x37   :  { %462 = vmatprep.subr.bf16.mxu1 %v559_v0  ;;  %479 = vmatpush3.bf16.msra.mxu0 %v508_v27 }
  0x38   :  { %480 = vmatprep.subr.bf16.mxu0 %v559_v0 }
  0x3a   :  { %463 = vmatpush3.bf16.msra.mxu1 %v502_v11 }
  0x3b   :  { %481 = vmatpush3.bf16.msra.mxu0 %v509_v28 }
  0x3c   :  { %482 = vmatprep.subr.bf16.mxu0 %v559_v0 }
  0x3f   :  { %483 = vmatpush3.bf16.msra.mxu0 %v510_v29 }
  0xe1   :  { %v114_v18 = vpop.f32.mrf.mxu0 }
  0xe2   :  { %v115_v20 = vadd.f32 %v392_v17, %v114_v18 }
  0xe3   :  { %v446_v19 = vpop.f32.mrf.mxu0 }
  0xe4   :  { %v121_v24 = vmax.f32 %v115_v20, 0.0 }
  0xe5   :  { %v117_v21 = vpop.f32.mrf.mxu0 }
  0xe6   :  { %v118_v22 = vadd.f32 %v392_v17, %v117_v21 }
  0xe7   :  { %v447_v23 = vpop.f32.mrf.mxu0 }
  0xe8   :  { %v122_v25 = vmax.f32 %v118_v22, 0.0 }
  0xea   :  { %v123_v26 = vpack.c.bf16 %v122_v25, %v121_v24 }
  0xec   :  { %465 = vmatmul.mubr.bf16.vlgmr.msra.gmra.mxu1 %v123_v26 }
 0x1ac   :  { %v229_v31 = vpop.f32.mrf.mxu1 }
 0x1ad   :  { %v230_v33 = vadd.f32 %v395_v30, %v229_v31 }
 0x1ae   :  { %v466_v32 = vpop.f32.mrf.mxu1 }
 0x1af   :  { %v236_v37 = vmax.f32 %v230_v33, 0.0 }
 0x1b0   :  { %v232_v34 = vpop.f32.mrf.mxu1 }
 0x1b1   :  { %v233_v35 = vadd.f32 %v395_v30, %v232_v34 }
 0x1b2   :  { %v467_v36 = vpop.f32.mrf.mxu1 }
 0x1b3   :  { %v237_v38 = vmax.f32 %v233_v35, 0.0 }
 0x1b5   :  { %v238_v39 = vpack.c.bf16 %v237_v38, %v236_v37 }
 0x1b7   :  { %485 = vmatmul.mubr.bf16.vlgmr.msra.gmra.mxu0 %v238_v39 }
 0x277   :  { %v344_v43 = vpop.f32.mrf.mxu0 }
 0x278   :  { %v345_v44 = vadd.f32 %v404_v42, %v344_v43 }
 0x279   :  { %v486_v45 = vpop.f32.mrf.mxu0 }
 0x27a   :  { %v370_v46 = vsel %vm368_vm3, %v345_v44, 0.0 }
 0x27b   :  { %v373_v47 = vrot.slane %v370_v46, 4  ;;  %v347_v48 = vpop.f32.mrf.mxu0 }
 0x27c   :  { %v348_v49 = vadd.f32 %v404_v42, %v347_v48 }
 0x27d   :  { %v374_v50 = vadd.f32 %v373_v47, %v370_v46  ;;  %v487_v51 = vpop.f32.mrf.mxu0 }
 0x27e   :  { %v420_v52 = vpack.c.bf16 %v348_v49, %v345_v44 }
 0x27f   :  { %v375_v53 = vrot.slane %v374_v50, 2 }
 0x280   :  { %421 = vst [vmem:[%s663_s7] sm:$0xff] %v420_v52  }
 0x281   :  { %v376_v54 = vadd.f32 %v375_v53, %v374_v50 }
 0x283   :  { %v377_v55 = vrot.slane %v376_v54, 1 }
 0x285   :  { %v378_v56 = vadd.f32 %v377_v55, %v376_v54 }
 0x287   :  { %v380_v57 = vsel %vm379_vm4, %v378_v56, 0.0 }
 0x288   :  { %381 = vst [vmem:[%s664_s8] sm:$0xff] %v380_v57 }
 0x289   :  { %390 = vsyncpa [#allocation3], 1 }
 0x28a   :  { %391 = vsyncpa [#allocation5], 1 }

</bundles_post_ra>
